<compile_context>
chip_gen: v7x
topology: tpu7x:2x2x1
jax: 0.10.0
libtpu: 0.0.40
codegen_flags: <defaults>
</compile_context>

<pallas_src>
import jax
import jax.numpy as jnp
from jax.experimental import pallas as pl
from jax.experimental.pallas import tpu as pltpu


_VMEM_TARGET = 40 << 20   # target for live (double-buffered in+out) windows
_VMEM_LIMIT = 48 << 20    # scoped-VMEM request (fits v7x's 64 MiB physical)


def _fwd_kernel(x_ref, o_ref):
    # x_ref: (tb, tc, 4, ts)  ->  o_ref: (tb, 4, tc, ts)
    for k in range(4):
        o_ref[:, k, :, :] = x_ref[:, :, k, :]


def _rev_kernel(x_ref, o_ref):
    # x_ref: (tb, 4, tc, ts)  ->  o_ref: (tb, tc, 4, ts)
    for k in range(4):
        o_ref[:, :, k, :] = x_ref[:, k, :, :]


def _pick_tiles(B, C, S, itemsize):
    """Choose (batch, channel, spatial) tile sizes.

    Keeps blocks ~_VMEM_TARGET/(2*(1+pad)) bytes, with channel tiles that are a
    multiple of the sublane tile (or the full C) and spatial tiles that are a
    multiple of 128 (or the full S), so every BlockSpec is (8,128)-legal.
    """
    sub = max(8, 32 // itemsize)          # sublane tile: 8 fp32 / 16 bf16 / 32 int8
    pad_in = max(1, sub // 4)             # quad-minor window pads its 4 rows to `sub`
    budget = max(1, _VMEM_TARGET // (2 * (1 + pad_in)))   # logical bytes per block

    def blk(tb, tc, ts):
        return tb * tc * 4 * ts * itemsize

    tc_min = min(C, sub)
    if blk(1, tc_min, S) <= budget or S <= 128:
        ts = S
        cap_c = max(1, budget // max(1, blk(1, 1, S)))
        if cap_c >= C:
            tc = C
            tb = int(min(B, max(1, budget // max(1, blk(1, C, S)))))
        else:
            tc = int(min(C, max(tc_min, (cap_c // sub) * sub)))
            tb = 1
    else:
        # One aligned channel with full S already busts the budget -> tile S.
        tc, tb = tc_min, 1
        cap_s = max(1, budget // max(1, blk(1, tc_min, 1)))
        ts = int(min(S, max(128, (cap_s // 128) * 128)))
    return tb, tc, ts


def _compiler_params(tb, tc, ts, itemsize):
    sub = max(8, 32 // itemsize)
    rnd = lambda v, m: ((v + m - 1) // m) * m
    lane = rnd(ts, 128)
    quad_minor_win = tb * rnd(tc, 1) * sub * lane * itemsize       # (.., tc, 4, ts) window
    chan_minor_win = tb * 4 * rnd(tc, sub) * lane * itemsize       # (.., 4, tc, ts) window
    need = 2 * (quad_minor_win + chan_minor_win) + (4 << 20)
    return pltpu.CompilerParams(
        dimension_semantics=("parallel", "parallel", "parallel"),
        vmem_limit_bytes=int(max(_VMEM_LIMIT, need)),
    )


def haar_wavelet(x, in_channels, rev=False):
    """Pallas implementation of HaarWavelet.forward (NCHW, same semantics)."""
    B = x.shape[0]
    C = in_channels
    itemsize = jnp.dtype(x.dtype).itemsize

    if not rev:
        _, cin, H, W = x.shape
        assert cin == C and H % 2 == 0 and W % 2 == 0
        h2, w2 = H // 2, W // 2
        S = h2 * w2
        x4 = x.reshape(B, C, 4, S)                       # free contiguous view
        tb, tc, ts = _pick_tiles(B, C, S, itemsize)
        out4 = pl.pallas_call(
            _fwd_kernel,
            out_shape=jax.ShapeDtypeStruct((B, 4, C, S), x.dtype),
            grid=(pl.cdiv(B, tb), pl.cdiv(C, tc), pl.cdiv(S, ts)),
            in_specs=[pl.BlockSpec((tb, tc, 4, ts),
                                   lambda bb, cc, ss: (bb, cc, 0, ss))],
            out_specs=pl.BlockSpec((tb, 4, tc, ts),
                                   lambda bb, cc, ss: (bb, 0, cc, ss)),
            compiler_params=_compiler_params(tb, tc, ts, itemsize),
        )(x4)
        return out4.reshape(B, 4 * C, h2, w2)            # free contiguous view
    else:
        _, c4, H, W = x.shape
        assert c4 == 4 * C
        S = H * W
        x4 = x.reshape(B, 4, C, S)                       # free contiguous view
        tb, tc, ts = _pick_tiles(B, C, S, itemsize)
        out4 = pl.pallas_call(
            _rev_kernel,
            out_shape=jax.ShapeDtypeStruct((B, C, 4, S), x.dtype),
            grid=(pl.cdiv(B, tb), pl.cdiv(C, tc), pl.cdiv(S, ts)),
            in_specs=[pl.BlockSpec((tb, 4, tc, ts),
                                   lambda bb, cc, ss: (bb, 0, cc, ss))],
            out_specs=pl.BlockSpec((tb, tc, 4, ts),
                                   lambda bb, cc, ss: (bb, cc, 0, ss)),
            compiler_params=_compiler_params(tb, tc, ts, itemsize),
        )(x4)
        return out4.reshape(B, C, 2 * H, 2 * W)          # free contiguous view


def haar_wavelet_reference(x, in_channels, rev=False):
    """Pure-JAX mirror of the PyTorch forward."""
    B = x.shape[0]
    C = in_channels
    H, W = x.shape[2], x.shape[3]
    if not rev:
        out = x.reshape(B, C, 4, H // 2, W // 2)
        out = jnp.transpose(out, (0, 2, 1, 3, 4)).reshape(B, 4 * C, H // 2, W // 2)
    else:
        out = x.reshape(B, 4, C, H, W)
        out = jnp.transpose(out, (0, 2, 1, 3, 4)).reshape(B, C, 2 * H, 2 * W)
    return out


if __name__ == "__main__":
    B, C, H, W = 2, 4, 16, 16
    key = jax.random.PRNGKey(0)
    x = jax.random.normal(key, (B, C, H, W), dtype=jnp.float32)

    # forward (rev=False): [B, C, H, W] -> [B, 4C, H/2, W/2]
    y = jax.block_until_ready(haar_wavelet(x, C, rev=False))
    y_ref = haar_wavelet_reference(x, C, rev=False)
    assert y.shape == (B, 4 * C, H // 2, W // 2), y.shape
    assert jnp.array_equal(y, y_ref), "forward (rev=False) mismatch"

    # reverse (rev=True): [B, 4C, H/2, W/2] -> [B, C, H, W]
    z = jax.block_until_ready(haar_wavelet(y, C, rev=True))
    z_ref = haar_wavelet_reference(y, C, rev=True)
    assert z.shape == (B, C, H, W), z.shape
    assert jnp.array_equal(z, z_ref), "forward (rev=True) mismatch"
    assert jnp.array_equal(z, x), "round-trip mismatch"

    print("KERNEL_OK")
</pallas_src>

<mosaic_0001>
module attributes {stable_mosaic.version = 11 : i64} {
  func.func @_fwd_kernel(%arg0: i32, %arg1: i32, %arg2: i32, %arg3: memref<2x4x4x64xf32, #tpu.memory_space<vmem>>, %arg4: memref<2x4x4x64xf32, #tpu.memory_space<vmem>>) attributes {dimension_semantics = [#tpu.dimension_semantics<parallel>, #tpu.dimension_semantics<parallel>, #tpu.dimension_semantics<parallel>], iteration_bounds = array<i64: 1, 1, 1>, scalar_prefetch = 0 : i64, scratch_operands = 0 : i64, tpu.core_type = #tpu.core_type<tc>, window_params = [{transform_indices = @transform_0, window_bounds = array<i64: 2, 4, 4, 64>}, {transform_indices = @transform_1, window_bounds = array<i64: 2, 4, 4, 64>}]} {
    %c0 = arith.constant 0 : index
    %c0_0 = arith.constant 0 : index
    %c0_1 = arith.constant 0 : index
    %c0_2 = arith.constant 0 : index
    %0 = vector.load %arg3[%c0, %c0_0, %c0_1, %c0_2] : memref<2x4x4x64xf32, #tpu.memory_space<vmem>>, vector<2x4x1x64xf32>
    %1 = vector.shape_cast %0 : vector<2x4x1x64xf32> to vector<2x4x64xf32>
    %c0_3 = arith.constant 0 : index
    %c0_4 = arith.constant 0 : index
    %c0_5 = arith.constant 0 : index
    %c0_6 = arith.constant 0 : index
    %2 = vector.load %arg4[%c0_3, %c0_4, %c0_5, %c0_6] : memref<2x4x4x64xf32, #tpu.memory_space<vmem>>, vector<2x1x4x64xf32>
    %3 = vector.shape_cast %2 : vector<2x1x4x64xf32> to vector<2x4x64xf32>
    %4 = vector.shape_cast %1 : vector<2x4x64xf32> to vector<2x1x4x64xf32>
    tpu.vector_store %arg4[%c0_3, %c0_4, %c0_5, %c0_6], %4 {strides = array<i32>} : memref<2x4x4x64xf32, #tpu.memory_space<vmem>>, vector<2x1x4x64xf32>,
    %c0_7 = arith.constant 0 : index
    %c0_8 = arith.constant 0 : index
    %c1 = arith.constant 1 : index
    %c0_9 = arith.constant 0 : index
    %5 = vector.load %arg3[%c0_7, %c0_8, %c1, %c0_9] : memref<2x4x4x64xf32, #tpu.memory_space<vmem>>, vector<2x4x1x64xf32>
    %6 = vector.shape_cast %5 : vector<2x4x1x64xf32> to vector<2x4x64xf32>
    %c0_10 = arith.constant 0 : index
    %c1_11 = arith.constant 1 : index
    %c0_12 = arith.constant 0 : index
    %c0_13 = arith.constant 0 : index
    %7 = vector.load %arg4[%c0_10, %c1_11, %c0_12, %c0_13] : memref<2x4x4x64xf32, #tpu.memory_space<vmem>>, vector<2x1x4x64xf32>
    %8 = vector.shape_cast %7 : vector<2x1x4x64xf32> to vector<2x4x64xf32>
    %9 = vector.shape_cast %6 : vector<2x4x64xf32> to vector<2x1x4x64xf32>
    tpu.vector_store %arg4[%c0_10, %c1_11, %c0_12, %c0_13], %9 {strides = array<i32>} : memref<2x4x4x64xf32, #tpu.memory_space<vmem>>, vector<2x1x4x64xf32>,
    %c0_14 = arith.constant 0 : index
    %c0_15 = arith.constant 0 : index
    %c2 = arith.constant 2 : index
    %c0_16 = arith.constant 0 : index
    %10 = vector.load %arg3[%c0_14, %c0_15, %c2, %c0_16] : memref<2x4x4x64xf32, #tpu.memory_space<vmem>>, vector<2x4x1x64xf32>
    %11 = vector.shape_cast %10 : vector<2x4x1x64xf32> to vector<2x4x64xf32>
    %c0_17 = arith.constant 0 : index
    %c2_18 = arith.constant 2 : index
    %c0_19 = arith.constant 0 : index
    %c0_20 = arith.constant 0 : index
    %12 = vector.load %arg4[%c0_17, %c2_18, %c0_19, %c0_20] : memref<2x4x4x64xf32, #tpu.memory_space<vmem>>, vector<2x1x4x64xf32>
    %13 = vector.shape_cast %12 : vector<2x1x4x64xf32> to vector<2x4x64xf32>
    %14 = vector.shape_cast %11 : vector<2x4x64xf32> to vector<2x1x4x64xf32>
    tpu.vector_store %arg4[%c0_17, %c2_18, %c0_19, %c0_20], %14 {strides = array<i32>} : memref<2x4x4x64xf32, #tpu.memory_space<vmem>>, vector<2x1x4x64xf32>,
    %c0_21 = arith.constant 0 : index
    %c0_22 = arith.constant 0 : index
    %c3 = arith.constant 3 : index
    %c0_23 = arith.constant 0 : index
    %15 = vector.load %arg3[%c0_21, %c0_22, %c3, %c0_23] : memref<2x4x4x64xf32, #tpu.memory_space<vmem>>, vector<2x4x1x64xf32>
    %16 = vector.shape_cast %15 : vector<2x4x1x64xf32> to vector<2x4x64xf32>
    %c0_24 = arith.constant 0 : index
    %c3_25 = arith.constant 3 : index
    %c0_26 = arith.constant 0 : index
    %c0_27 = arith.constant 0 : index
    %17 = vector.load %arg4[%c0_24, %c3_25, %c0_26, %c0_27] : memref<2x4x4x64xf32, #tpu.memory_space<vmem>>, vector<2x1x4x64xf32>
    %18 = vector.shape_cast %17 : vector<2x1x4x64xf32> to vector<2x4x64xf32>
    %19 = vector.shape_cast %16 : vector<2x4x64xf32> to vector<2x1x4x64xf32>
    tpu.vector_store %arg4[%c0_24, %c3_25, %c0_26, %c0_27], %19 {strides = array<i32>} : memref<2x4x4x64xf32, #tpu.memory_space<vmem>>, vector<2x1x4x64xf32>,
    return
  }
  func.func @transform_0(%arg0: i32, %arg1: i32, %arg2: i32) -> (i32, i32, i32, i32) {
    %c0_i32 = arith.constant 0 : i32
    %c0_i32_0 = arith.constant 0 : i32
    return %arg0, %arg1, %c0_i32, %arg2 : i32, i32, i32, i32
  }
  func.func @transform_1(%arg0: i32, %arg1: i32, %arg2: i32) -> (i32, i32, i32, i32) {
    %c0_i32 = arith.constant 0 : i32
    %c0_i32_0 = arith.constant 0 : i32
    return %arg0, %c0_i32, %arg1, %arg2 : i32, i32, i32, i32
  }
}

</mosaic_0001>

<bundles_post_ra>
// kernel: tpu_custom_call.1
= control target key start
LH: loop header
LB: loop body
LE: loop exit
PB: predicated region body
PF: predicated region fallthrough
CT: control target
= control target key end

     0   :  { %6 = vsyncpa [#allocation3], 0  ;;  %s303_s0 = inlined_call_operand.hbm [shape: f32[2,4,4,64], index: 0, kind: input, shape index: {}]   ;;  %s304_s1 = inlined_call_operand.hbm [shape: f32[2,4,4,64], index: 1, kind: output, shape index: {}]  }
   0x1   :  { %7 = vsyncpa [#allocation4], 0  ;;  %s227_s6 = smov [#allocation2]   ;;  %s179_s10 = scalar_lea.hbm %s303_s0, 512 }
   0x2   :  { %s13_s7 = sshll.u32 %s227_s6, 4  ;;  %p180_p0 = scmp.ne.s32.totalorder %s303_s0, %s179_s10  ;;  %s14_s7 = int_to_ptr.vmem [resolvable:$true] %s13_s7 }
   0x3   :  { %p183_p1 = scmp.lt.u32.totalorder %s179_s10, %s303_s0 }
   0x5   :  { %p185_p2 = pnand %p183_p1, %p180_p0 }
   0x7   :  { %188 = shalt.err (!%p185_p2)
}
   0x8   :  { %s189_s15 = scalar_lea.vmem %s14_s7, 512  ;;  %p194_p4 = scmp.lt.s32.totalorder %s14_s7, %s14_s7 }
   0x9   :  { %p190_p3 = scmp.ne.s32.totalorder %s14_s7, %s189_s15  ;;  %p195_p5 = scmp.lt.s32.totalorder %s189_s15, %s189_s15 }
   0xb   :  { %p196_p6 = por %p195_p5, %p194_p4 }
   0xd   :  { %p197_p7 = pnand %p196_p6, %p190_p3 }
   0xf   :  { %200 = shalt.err (!%p197_p7)
}
  0x10   :  { %s228_s16 = smov 64   ;;  %s229_s17 = smov 4  }
  0x11   :  { %19 = dma.hbm_to_vmem [thread:$0]  %s303_s0, 512, %s14_s7, [#allocation3], %s228_s16, %s228_s16, %s229_s17  }
  0x12   :  { %223 = dma.done.wait [#allocation3], 512  }
  0x13   :  { %224 = vsyncadd [#allocation3], 4294966784  ;;  %vm40_vm0 = vcmask 1041409   ;;  %vm43_vm1 = vcmask 1042434   ;;  %vm46_vm2 = vcmask 1043459   ;;  %vm56_vm3 = vcmask 519168  }
  0x14   :  { %v23_v0 = vld [vmem:[#allocation2] sm:$0x1]  ;;  %v24_v1 = vld [vmem:[#allocation2 + $0x4] sm:$0x1]  ;;  %v25_v2 = vld [vmem:[#allocation2 + $0x8] sm:$0x1] }
  0x15   :  { %v26_v3 = vld [vmem:[#allocation2 + $0xc] sm:$0x1]  ;;  %v39_v4 = vrot.slane %v24_v1, 7  ;;  %v42_v5 = vrot.slane %v25_v2, 6  ;;  %v27_v6 = vld [vmem:[#allocation2 + $0x10] sm:$0x1] }
  0x16   :  { %v45_v7 = vrot.slane %v26_v3, 5  ;;  %v28_v8 = vld [vmem:[#allocation2 + $0x14] sm:$0x1]  ;;  %v29_v9 = vld [vmem:[#allocation2 + $0x18] sm:$0x1]  ;;  %s230_s0 = smov [#allocation5]  }
  0x17   :  { %v41_v10 = vsel %vm40_vm0, %v39_v4, %v23_v0  ;;  %v30_v11 = vld [vmem:[#allocation2 + $0x1c] sm:$0x1]  ;;  %v48_v12 = vrot.slane %v28_v8, 7  ;;  %v50_v13 = vrot.slane %v29_v9, 6  ;;  %v59_v14 = vld [vmem:[#allocation2 + $0x1] sm:$0x1] }
  0x18   :  { %v44_v15 = vsel %vm43_vm1, %v42_v5, %v41_v10  ;;  %v52_v16 = vrot.slane %v30_v11, 5  ;;  %v60_v17 = vld [vmem:[#allocation2 + $0x5] sm:$0x1]  ;;  %v61_v18 = vld [vmem:[#allocation2 + $0x9] sm:$0x1]  ;;  %s163_s20 = sshll.u32 %s230_s0, 4  ;;  %s164_s20 = int_to_ptr.vmem [resolvable:$true] %s163_s20 }
  0x19   :  { %v47_v19 = vsel %vm46_vm2, %v45_v7, %v44_v15  ;;  %v49_v20 = vsel %vm40_vm0, %v48_v12, %v27_v6  ;;  %v62_v21 = vld [vmem:[#allocation2 + $0xd] sm:$0x1]  ;;  %v75_v22 = vrot.slane %v60_v17, 7  ;;  %v77_v23 = vrot.slane %v61_v18, 6  ;;  %v63_v24 = vld [vmem:[#allocation2 + $0x11] sm:$0x1]  ;;  %p206_p9 = scmp.lt.s32.totalorder %s164_s20, %s164_s20 }
  0x1a   :  { %57 = vst.msk [vmem:[#allocation5] sm:$0xf] %vm56_vm3, %v47_v19  ;;  %v51_v25 = vsel %vm43_vm1, %v50_v13, %v49_v20  ;;  %v79_v26 = vrot.slane %v62_v21, 5  ;;  %v64_v27 = vld [vmem:[#allocation2 + $0x15] sm:$0x1]  ;;  %s201_s21 = scalar_lea.vmem %s164_s20, 512 }
  0x1b   :  { %v65_v28 = vld [vmem:[#allocation2 + $0x19] sm:$0x1]  ;;  %v53_v29 = vsel %vm46_vm2, %v52_v16, %v51_v25  ;;  %v76_v30 = vsel %vm40_vm0, %v75_v22, %v59_v14  ;;  %v66_v31 = vld [vmem:[#allocation2 + $0x1d] sm:$0x1]  ;;  %v81_v32 = vrot.slane %v64_v27, 7  ;;  %p202_p8 = scmp.ne.s32.totalorder %s164_s20, %s201_s21  ;;  %p207_p10 = scmp.lt.s32.totalorder %s201_s21, %s201_s21 }
  0x1c   :  { %v83_v33 = vrot.slane %v65_v28, 6  ;;  %v92_v34 = vld [vmem:[#allocation2 + $0x2] sm:$0x1]  ;;  %58 = vst.msk [vmem:[#allocation5 + $0x10] sm:$0xf] %vm56_vm3, %v53_v29  ;;  %v78_v35 = vsel %vm43_vm1, %v77_v23, %v76_v30  ;;  %v85_v36 = vrot.slane %v66_v31, 5 }
  0x1d   :  { %v93_v37 = vld [vmem:[#allocation2 + $0x6] sm:$0x1]  ;;  %v94_v38 = vld [vmem:[#allocation2 + $0xa] sm:$0x1]  ;;  %v80_v39 = vsel %vm46_vm2, %v79_v26, %v78_v35  ;;  %v82_v40 = vsel %vm40_vm0, %v81_v32, %v63_v24  ;;  %v95_v41 = vld [vmem:[#allocation2 + $0xe] sm:$0x1]  ;;  %p208_p11 = por %p207_p10, %p206_p9 }
  0x1e   :  { %v108_v42 = vrot.slane %v93_v37, 7  ;;  %v110_v43 = vrot.slane %v94_v38, 6  ;;  %v96_v44 = vld [vmem:[#allocation2 + $0x12] sm:$0x1]  ;;  %90 = vst.msk [vmem:[#allocation5 + $0x4] sm:$0xf] %vm56_vm3, %v80_v39  ;;  %v84_v45 = vsel %vm43_vm1, %v83_v33, %v82_v40 }
  0x1f   :  { %v112_v46 = vrot.slane %v95_v41, 5  ;;  %v97_v47 = vld [vmem:[#allocation2 + $0x16] sm:$0x1]  ;;  %v98_v48 = vld [vmem:[#allocation2 + $0x1a] sm:$0x1]  ;;  %v86_v49 = vsel %vm46_vm2, %v85_v36, %v84_v45  ;;  %p209_p12 = pnand %p208_p11, %p202_p8 }
  0x20   :  { %v109_v50 = vsel %vm40_vm0, %v108_v42, %v92_v34  ;;  %v99_v51 = vld [vmem:[#allocation2 + $0x1e] sm:$0x1]  ;;  %v114_v52 = vrot.slane %v97_v47, 7  ;;  %v116_v53 = vrot.slane %v98_v48, 6  ;;  %v125_v54 = vld [vmem:[#allocation2 + $0x3] sm:$0x1] }
  0x21   :  { %91 = vst.msk [vmem:[#allocation5 + $0x14] sm:$0xf] %vm56_vm3, %v86_v49  ;;  %v111_v55 = vsel %vm43_vm1, %v110_v43, %v109_v50  ;;  %v118_v56 = vrot.slane %v99_v51, 5  ;;  %v126_v57 = vld [vmem:[#allocation2 + $0x7] sm:$0x1] }
  0x22   :  { %v127_v58 = vld [vmem:[#allocation2 + $0xb] sm:$0x1]  ;;  %v113_v59 = vsel %vm46_vm2, %v112_v46, %v111_v55  ;;  %v115_v60 = vsel %vm40_vm0, %v114_v52, %v96_v44  ;;  %v128_v61 = vld [vmem:[#allocation2 + $0xf] sm:$0x1]  ;;  %v141_v62 = vrot.slane %v126_v57, 7 }
  0x23   :  { %v143_v63 = vrot.slane %v127_v58, 6  ;;  %v129_v0 = vld [vmem:[#allocation2 + $0x13] sm:$0x1]  ;;  %123 = vst.msk [vmem:[#allocation5 + $0x8] sm:$0xf] %vm56_vm3, %v113_v59  ;;  %v117_v1 = vsel %vm43_vm1, %v116_v53, %v115_v60  ;;  %v145_v2 = vrot.slane %v128_v61, 5 }
  0x24   :  { %v130_v3 = vld [vmem:[#allocation2 + $0x17] sm:$0x1]  ;;  %v131_v4 = vld [vmem:[#allocation2 + $0x1b] sm:$0x1]  ;;  %v119_v5 = vsel %vm46_vm2, %v118_v56, %v117_v1  ;;  %v142_v6 = vsel %vm40_vm0, %v141_v62, %v125_v54  ;;  %v132_v7 = vld [vmem:[#allocation2 + $0x1f] sm:$0x1] }
  0x25   :  { %v147_v8 = vrot.slane %v130_v3, 7  ;;  %v149_v9 = vrot.slane %v131_v4, 6  ;;  %124 = vst.msk [vmem:[#allocation5 + $0x18] sm:$0xf] %vm56_vm3, %v119_v5  ;;  %v144_v10 = vsel %vm43_vm1, %v143_v63, %v142_v6  ;;  %v151_v11 = vrot.slane %v132_v7, 5 }
  0x26   :  { %v146_v12 = vsel %vm46_vm2, %v145_v2, %v144_v10 }
  0x27   :  { %v148_v13 = vsel %vm40_vm0, %v147_v8, %v129_v0  ;;  %156 = vst.msk [vmem:[#allocation5 + $0xc] sm:$0xf] %vm56_vm3, %v146_v12 }
  0x28   :  { %v150_v14 = vsel %vm43_vm1, %v149_v9, %v148_v13 }
  0x29   :  { %v152_v15 = vsel %vm46_vm2, %v151_v11, %v150_v14 }
  0x2a   :  { %157 = vst.msk [vmem:[#allocation5 + $0x1c] sm:$0xf] %vm56_vm3, %v152_v15 }
  0x2b   :  { %212 = shalt.err (!%p209_p12)
}
  0x2c   :  { %s213_s24 = scalar_lea.hbm %s304_s1, 512 }
  0x2d   :  { %p214_p13 = scmp.ne.s32.totalorder %s304_s1, %s213_s24  ;;  %p217_p0 = scmp.lt.u32.totalorder %s213_s24, %s304_s1 }
  0x2f   :  { %p219_p1 = pnand %p217_p0, %p214_p13 }
  0x31   :  { %222 = shalt.err (!%p219_p1)
}
  0x32   :  { %169 = dma.vmem_to_hbm [thread:$0]  %s164_s20, 512, %s304_s1, [#allocation4], %s228_s16, %s228_s16, %s229_s17  }
  0x33   :  { %225 = dma.done.wait [#allocation4], 512  }
  0x34   :  { %226 = vsyncadd [#allocation4], 4294966784 }
  0x35   :  { %173 = vsyncpa [#allocation3], 1 }
  0x36   :  { %174 = vsyncpa [#allocation4], 1 }

</bundles_post_ra>
